<compile_context>
chip_gen: v7x
topology: tpu7x:2x2x1
jax: 0.10.0
libtpu: 0.0.40
codegen_flags: <defaults>
</compile_context>

<pallas_src>
import functools

import jax
import jax.numpy as jnp
from jax.experimental import pallas as pl
from jax.experimental.pallas import tpu as pltpu

LANE = 128                     # vreg lane width
SUBLANES = 8                   # vreg sublane count
MAX_BLOCK_ROWS = 4096          # (4096, 128) f32 = 2 MiB per input per buffer
NUM_PARTITIONS = 2             # parallel grid axis (megacore on v7x)
VMEM_LIMIT_BYTES = 48 * 1024 * 1024


def _abs_pow(d, p):
    """|d|^p, using VPU multiplies for positive integer p (keeps EUP free)."""
    if p == 1:
        return d
    if float(p) == int(p) and int(p) > 0:
        out = d
        for _ in range(int(p) - 1):
            out = out * d
        return out
    return d ** jnp.float32(p)  # generic non-integer p fallback


def _lp_loss_kernel(x_ref, t_ref, o_ref, *, p, block_rows, steps_per_part,
                    numel, may_need_mask):
    pi = pl.program_id(0)   # parallel partition
    si = pl.program_id(1)   # reduction step within partition

    @pl.when(si == 0)
    def _():
        o_ref[...] = jnp.zeros_like(o_ref)

    # Logical (unclamped) row-block index handled by this grid step.
    blk = pi * steps_per_part + si

    x = x_ref[...].astype(jnp.float32)
    t = t_ref[...].astype(jnp.float32)
    diff = jnp.abs(t - jax.nn.sigmoid(x))
    v = _abs_pow(diff, p)

    def accumulate(val):
        # VPU-only partial reduction: (block_rows, 128) -> (8, 128) vreg sums,
        # accumulated into the resident output block (no cross-lane XLU work).
        o_ref[...] += jnp.sum(val.reshape(-1, SUBLANES, LANE), axis=0)

    if not may_need_mask:
        # Statically known: every grid step covers a full, unique, in-bounds
        # block -> no mask code emitted at all.
        accumulate(v)
    else:
        block_elems = block_rows * LANE
        is_full = (blk + 1) * block_elems <= numel

        @pl.when(is_full)
        def _():
            accumulate(v)

        @pl.when(jnp.logical_not(is_full))
        def _():
            # Ragged tail / partial OOB block / clamped duplicate block:
            # zero out every element whose logical flat index >= numel.
            full_rows = numel // LANE
            rem = numel % LANE
            row = jax.lax.broadcasted_iota(jnp.int32, v.shape, 0) + blk * block_rows
            lane = jax.lax.broadcasted_iota(jnp.int32, v.shape, 1)
            in_bounds = (row < full_rows) | ((row == full_rows) & (lane < rem))
            accumulate(jnp.where(in_bounds, v, 0.0))


def lp_loss(inp, target, p=2, size_average=True, max_block_rows=MAX_BLOCK_ROWS):
    """Pallas TPU implementation of LpLoss.forward(input, target)."""
    assert inp.shape == target.shape
    numel = int(inp.size)

    # Lane-dense (rows, 128) view. Inputs stay in native dtype; only a tiny
    # alignment pad (< 1024 elements) is added when needed — its contribution
    # is removed by the in-kernel mask.
    x = jnp.ravel(inp)
    t = jnp.ravel(target)
    slab = SUBLANES * LANE
    padded = pl.cdiv(numel, slab) * slab
    pad = padded - numel
    if pad:
        x = jnp.pad(x, (0, pad))
        t = jnp.pad(t, (0, pad))
    rows = padded // LANE
    x = x.reshape(rows, LANE)
    t = t.reshape(rows, LANE)

    block_rows = min(max_block_rows, rows)
    nb = pl.cdiv(rows, block_rows)               # total row-blocks
    npart = max(1, min(NUM_PARTITIONS, nb))      # parallel partitions
    steps = pl.cdiv(nb, npart)                   # reduction steps / partition

    # Masking can only ever be required if the element count is not a multiple
    # of the block size (ragged tail / partial block) or the block count does
    # not divide evenly across partitions (clamped duplicate trailing steps).
    may_need_mask = (numel % (block_rows * LANE) != 0) or (nb % npart != 0)

    def in_map(pi, si):
        # Clamp so any excess trailing step stays in-bounds; the kernel masks
        # its contribution to zero (its logical indices are >= numel).
        return (jnp.minimum(pi * steps + si, nb - 1), 0)

    kernel = functools.partial(
        _lp_loss_kernel,
        p=p,
        block_rows=block_rows,
        steps_per_part=steps,
        numel=numel,
        may_need_mask=may_need_mask,
    )

    partials = pl.pallas_call(
        kernel,
        out_shape=jax.ShapeDtypeStruct((npart * SUBLANES, LANE), jnp.float32),
        grid_spec=pltpu.PrefetchScalarGridSpec(
            num_scalar_prefetch=0,
            grid=(npart, steps),
            in_specs=[
                pl.BlockSpec((block_rows, LANE), in_map),
                pl.BlockSpec((block_rows, LANE), in_map),
            ],
            out_specs=pl.BlockSpec((SUBLANES, LANE), lambda pi, si: (pi, 0)),
        ),
        compiler_params=pltpu.CompilerParams(
            dimension_semantics=("parallel", "arbitrary"),
            vmem_limit_bytes=VMEM_LIMIT_BYTES,
        ),
    )(x, t)

    # Single cross-lane reduce + root + normalization (trivial epilogue).
    total = jnp.sum(partials)
    if p == 2:
        loss = jnp.sqrt(total)
    elif p == 1:
        loss = total
    else:
        loss = total ** (1.0 / p)
    if size_average:
        loss = loss / numel
    return loss


def lp_loss_ref(inp, target, p=2, size_average=True):
    rec = jax.nn.sigmoid(inp.astype(jnp.float32))
    loss = jnp.sum(jnp.abs(target.astype(jnp.float32) - rec) ** p) ** (1.0 / p)
    if size_average:
        loss = loss / inp.size
    return loss


if __name__ == "__main__":
    key = jax.random.PRNGKey(0)
    k1, k2 = jax.random.split(key)

    # Primary test: NCHW input, defaults (p=2, size_average=True).
    x = jax.random.normal(k1, (2, 4, 16, 16), dtype=jnp.float32)
    y = jax.random.uniform(k2, (2, 4, 16, 16), dtype=jnp.float32)
    out = jax.block_until_ready(lp_loss(x, y, p=2, size_average=True))
    ref = lp_loss_ref(x, y, p=2, size_average=True)
    assert jnp.allclose(out, ref, rtol=1e-5, atol=1e-6), (out, ref)

    # Multi-block + parallel-axis path (tiny blocks to force several steps),
    # p=3 exercises the integer-pow specialization, size_average=False.
    out2 = jax.block_until_ready(lp_loss(x, y, p=3, size_average=False,
                                         max_block_rows=8))
    ref2 = lp_loss_ref(x, y, p=3, size_average=False)
    assert jnp.allclose(out2, ref2, rtol=1e-5, atol=1e-6), (out2, ref2)

    # Odd block count (exercises the clamped excess grid step + masked path).
    k3, k4 = jax.random.split(k2)
    x3 = jax.random.normal(k3, (3, 4, 16, 16), dtype=jnp.float32)
    y3 = jax.random.uniform(k4, (3, 4, 16, 16), dtype=jnp.float32)
    out3 = jax.block_until_ready(lp_loss(x3, y3, p=2, size_average=True,
                                         max_block_rows=8))
    ref3 = lp_loss_ref(x3, y3, p=2, size_average=True)
    assert jnp.allclose(out3, ref3, rtol=1e-5, atol=1e-6), (out3, ref3)

    # Ragged tail (numel not a multiple of 1024) -> in-kernel mask path.
    k5, k6 = jax.random.split(k4)
    x4 = jax.random.normal(k5, (1, 3, 11, 13), dtype=jnp.float32)
    y4 = jax.random.uniform(k6, (1, 3, 11, 13), dtype=jnp.float32)
    out4 = jax.block_until_ready(lp_loss(x4, y4, p=2, size_average=True))
    ref4 = lp_loss_ref(x4, y4, p=2, size_average=True)
    assert jnp.allclose(out4, ref4, rtol=1e-5, atol=1e-6), (out4, ref4)

    print("KERNEL_OK")
</pallas_src>

<mosaic_0001>
module attributes {stable_mosaic.version = 11 : i64} {
  func.func @_lp_loss_kernel(%arg0: i32, %arg1: i32, %arg2: memref<16x128xf32, #tpu.memory_space<vmem>>, %arg3: memref<16x128xf32, #tpu.memory_space<vmem>>, %arg4: memref<8x128xf32, #tpu.memory_space<vmem>>) attributes {dimension_semantics = [#tpu.dimension_semantics<parallel>, #tpu.dimension_semantics<arbitrary>], iteration_bounds = array<i64: 1, 1>, scalar_prefetch = 0 : i64, scratch_operands = 0 : i64, tpu.core_type = #tpu.core_type<tc>, window_params = [{transform_indices = @transform_0, window_bounds = array<i64: 16, 128>}, {transform_indices = @transform_1, window_bounds = array<i64: 16, 128>}, {transform_indices = @transform_2, window_bounds = array<i64: 8, 128>}]} {
    %c0_i32 = arith.constant 0 : i32
    %0 = arith.cmpi eq, %arg1, %c0_i32 : i32
    %1 = arith.extui %0 : i1 to i32
    %c0_i32_0 = arith.constant 0 : i32
    %2 = arith.cmpi ne, %1, %c0_i32_0 : i32
    scf.if %2 {
      %cst_9 = arith.constant 0.000000e+00 : f32
      %18 = vector.broadcast %cst_9 : f32 to vector<8x128xf32>
      %c0_10 = arith.constant 0 : index
      %c0_11 = arith.constant 0 : index
      %19 = vector.load %arg4[%c0_10, %c0_11] : memref<8x128xf32, #tpu.memory_space<vmem>>, vector<8x128xf32>
      tpu.vector_store %arg4[%c0_10, %c0_11], %18 {strides = array<i32>} : memref<8x128xf32, #tpu.memory_space<vmem>>, vector<8x128xf32>,
    } else {
    }
    %c0 = arith.constant 0 : index
    %c0_1 = arith.constant 0 : index
    %3 = vector.load %arg2[%c0, %c0_1] : memref<16x128xf32, #tpu.memory_space<vmem>>, vector<16x128xf32>
    %c0_2 = arith.constant 0 : index
    %c0_3 = arith.constant 0 : index
    %4 = vector.load %arg3[%c0_2, %c0_3] : memref<16x128xf32, #tpu.memory_space<vmem>>, vector<16x128xf32>
    %5 = arith.negf %3 : vector<16x128xf32>
    %6 = math.exp %5 : vector<16x128xf32>
    %cst = arith.constant 1.000000e+00 : f32
    %7 = vector.broadcast %cst : f32 to vector<16x128xf32>
    %8 = arith.addf %7, %6 : vector<16x128xf32>
    %9 = arith.divf %7, %8 : vector<16x128xf32>
    %10 = arith.subf %4, %9 : vector<16x128xf32>
    %11 = math.absf %10 : vector<16x128xf32>
    %12 = arith.mulf %11, %11 : vector<16x128xf32>
    %c0_4 = arith.constant 0 : index
    %c0_5 = arith.constant 0 : index
    %13 = vector.load %arg4[%c0_4, %c0_5] : memref<8x128xf32, #tpu.memory_space<vmem>>, vector<8x128xf32>
    %14 = vector.shape_cast %12 : vector<16x128xf32> to vector<2x8x128xf32>
    %cst_6 = arith.constant dense<0.000000e+00> : vector<8x128xf32>
    %15 = vector.multi_reduction <add>, %14, %cst_6 [0] : vector<2x8x128xf32> to vector<8x128xf32>
    %16 = arith.addf %13, %15 : vector<8x128xf32>
    %c0_7 = arith.constant 0 : index
    %c0_8 = arith.constant 0 : index
    %17 = vector.load %arg4[%c0_7, %c0_8] : memref<8x128xf32, #tpu.memory_space<vmem>>, vector<8x128xf32>
    tpu.vector_store %arg4[%c0_7, %c0_8], %16 {strides = array<i32>} : memref<8x128xf32, #tpu.memory_space<vmem>>, vector<8x128xf32>,
    return
  }
  func.func @transform_0(%arg0: i32, %arg1: i32) -> (i32, i32) {
    %c1_i32 = arith.constant 1 : i32
    %0 = arith.muli %arg0, %c1_i32 : i32
    %1 = arith.addi %0, %arg1 : i32
    %c0_i32 = arith.constant 0 : i32
    %2 = arith.minsi %1, %c0_i32 : i32
    %c0_i32_0 = arith.constant 0 : i32
    %c0_i32_1 = arith.constant 0 : i32
    return %2, %c0_i32_0 : i32, i32
  }
  func.func @transform_1(%arg0: i32, %arg1: i32) -> (i32, i32) {
    %c1_i32 = arith.constant 1 : i32
    %0 = arith.muli %arg0, %c1_i32 : i32
    %1 = arith.addi %0, %arg1 : i32
    %c0_i32 = arith.constant 0 : i32
    %2 = arith.minsi %1, %c0_i32 : i32
    %c0_i32_0 = arith.constant 0 : i32
    %c0_i32_1 = arith.constant 0 : i32
    return %2, %c0_i32_0 : i32, i32
  }
  func.func @transform_2(%arg0: i32, %arg1: i32) -> (i32, i32) {
    %c0_i32 = arith.constant 0 : i32
    %c0_i32_0 = arith.constant 0 : i32
    return %arg0, %c0_i32 : i32, i32
  }
}

</mosaic_0001>

<bundles_post_ra>
// kernel: tpu_custom_call.1
= control target key start
LH: loop header
LB: loop body
LE: loop exit
PB: predicated region body
PF: predicated region fallthrough
CT: control target
= control target key end

     0   :  { %7 = vsyncpa [#allocation3], 0  ;;  %s255_s0 = inlined_call_operand.hbm [shape: f32[16,128], index: 0, kind: input, shape index: {}]   ;;  %s256_s1 = inlined_call_operand.hbm [shape: f32[16,128], index: 1, kind: input, shape index: {}]   ;;  %s257_s2 = inlined_call_operand.hbm [shape: f32[8,128], index: 2, kind: output, shape index: {}]  }
   0x1   :  { %8 = vsyncpa [#allocation6], 0 }
   0x2   :  { %9 = vsyncpa [#allocation4], 0  ;;  %s199_s9 = smov [#allocation2]   ;;  %s127_s13 = scalar_lea.hbm %s255_s0, 256 }
   0x3   :  { %s21_s10 = sshll.u32 %s199_s9, 4  ;;  %p128_p0 = scmp.ne.s32.totalorder %s255_s0, %s127_s13  ;;  %s22_s10 = int_to_ptr.vmem [resolvable:$true] %s21_s10 }
   0x4   :  { %p131_p1 = scmp.lt.u32.totalorder %s127_s13, %s255_s0 }
   0x6   :  { %p133_p2 = pnand %p131_p1, %p128_p0 }
   0x8   :  { %136 = shalt.err (!%p133_p2)
}
   0x9   :  { %s137_s18 = scalar_lea.vmem %s22_s10, 256  ;;  %p142_p4 = scmp.lt.s32.totalorder %s22_s10, %s22_s10 }
   0xa   :  { %p138_p3 = scmp.ne.s32.totalorder %s22_s10, %s137_s18  ;;  %p143_p5 = scmp.lt.s32.totalorder %s137_s18, %s137_s18 }
   0xc   :  { %p144_p6 = por %p143_p5, %p142_p4 }
   0xe   :  { %p145_p7 = pnand %p144_p6, %p138_p3 }
  0x10   :  { %148 = shalt.err (!%p145_p7)
}
  0x11   :  { %s200_s19 = smov 128   ;;  %s201_s20 = smov 8  }
  0x12   :  { %27 = dma.hbm_to_vmem [thread:$0]  %s255_s0, 256, %s22_s10, [#allocation3], %s200_s19, %s200_s19, %s201_s20  }
  0x13   :  { %s202_s23 = smov [#allocation5]   ;;  %s149_s27 = scalar_lea.hbm %s256_s1, 256 }
  0x14   :  { %s39_s24 = sshll.u32 %s202_s23, 4  ;;  %p150_p8 = scmp.ne.s32.totalorder %s256_s1, %s149_s27  ;;  %s40_s24 = int_to_ptr.vmem [resolvable:$true] %s39_s24 }
  0x15   :  { %p153_p9 = scmp.lt.u32.totalorder %s149_s27, %s256_s1 }
  0x17   :  { %p155_p10 = pnand %p153_p9, %p150_p8 }
  0x19   :  { %158 = shalt.err (!%p155_p10)
}
  0x1a   :  { %s159_s4 = scalar_lea.vmem %s40_s24, 256  ;;  %p164_p12 = scmp.lt.s32.totalorder %s40_s24, %s40_s24 }
  0x1b   :  { %p160_p11 = scmp.ne.s32.totalorder %s40_s24, %s159_s4  ;;  %p165_p13 = scmp.lt.s32.totalorder %s159_s4, %s159_s4 }
  0x1d   :  { %p166_p0 = por %p165_p13, %p164_p12 }
  0x1f   :  { %p167_p1 = pnand %p166_p0, %p160_p11 }
  0x21   :  { %170 = shalt.err (!%p167_p1)
}
  0x22   :  { %45 = dma.hbm_to_vmem [thread:$0]  %s256_s1, 256, %s40_s24, [#allocation6], %s200_s19, %s200_s19, %s201_s20  }
  0x23   :  { %193 = dma.done.wait [#allocation3], 256  }
  0x24   :  { %194 = vsyncadd [#allocation3], 4294967040 }
  0x25   :  { %195 = dma.done.wait [#allocation6], 256  }
  0x26   :  { %196 = vsyncadd [#allocation6], 4294967040  ;;  %v65_v0 = vld [vmem:[#allocation2] sm:$0xff]  ;;  %v66_v1 = vld [vmem:[#allocation2 + $0x8] sm:$0xff]  ;;  %s203_s1 = smov [#allocation7]  }
  0x27   :  { %v111_v2 = vmul.f32 -1.442695, %v65_v0  ;;  %v112_v3 = vmul.f32 -1.442695, %v66_v1  ;;  %v67_v8 = vld [vmem:[#allocation5] sm:$0xff]  ;;  %v68_v9 = vld [vmem:[#allocation5 + $0x8] sm:$0xff] }
  0x28   :  { %s97_s6 = sshll.u32 %s203_s1, 4  ;;  %s98_s6 = int_to_ptr.vmem [resolvable:$true] %s97_s6 }
  0x29   :  { %119 = vpow2.f32 %v111_v2  ;;  %s171_s7 = scalar_lea.vmem %s98_s6, 128  ;;  %p176_p3 = scmp.lt.s32.totalorder %s98_s6, %s98_s6 }
  0x2a   :  { %121 = vpow2.f32 %v112_v3  ;;  %p172_p2 = scmp.ne.s32.totalorder %s98_s6, %s171_s7  ;;  %p177_p4 = scmp.lt.s32.totalorder %s171_s7, %s171_s7 }
  0x2c   :  { %p178_p5 = por %p177_p4, %p176_p3 }
  0x2e   :  { %p179_p6 = pnand %p178_p5, %p172_p2 }
  0x33   :  { %v120_v4 = vpop.eup %119 }
  0x34   :  { %v122_v5 = vpop.eup %121  ;;  %v75_v6 = vadd.f32 1.0, %v120_v4 }
  0x35   :  { %v76_v7 = vadd.f32 1.0, %v122_v5 }
  0x36   :  { %123 = vrcp.f32 %v75_v6 }
  0x37   :  { %125 = vrcp.f32 %v76_v7 }
  0x40   :  { %v124_v10 = vpop.eup %123 }
  0x41   :  { %v126_v11 = vpop.eup %125  ;;  %v81_v12 = vsub.f32 %v67_v8, %v124_v10 }
  0x42   :  { %v82_v13 = vsub.f32 %v68_v9, %v126_v11 }
  0x43   :  { %v83_v14 = vand.u32 2147483647, %v81_v12 }
  0x44   :  { %v84_v15 = vand.u32 2147483647, %v82_v13 }
  0x45   :  { %v85_v16 = vmul.f32 %v83_v14, %v83_v14 }
  0x46   :  { %v86_v17 = vmul.f32 %v84_v15, %v84_v15 }
  0x48   :  { %v88_v18 = vadd.f32 %v86_v17, %v85_v16 }
  0x4a   :  { %90 = vst [vmem:[#allocation7] sm:$0xff] %v88_v18 }
  0x4b   :  { %182 = shalt.err (!%p179_p6)
}
  0x4c   :  { %s183_s10 = scalar_lea.hbm %s257_s2, 128 }
  0x4d   :  { %p184_p7 = scmp.ne.s32.totalorder %s257_s2, %s183_s10  ;;  %p187_p8 = scmp.lt.u32.totalorder %s183_s10, %s257_s2 }
  0x4f   :  { %p189_p9 = pnand %p187_p8, %p184_p7 }
  0x51   :  { %192 = shalt.err (!%p189_p9)
}
  0x52   :  { %100 = dma.vmem_to_hbm [thread:$0]  %s98_s6, 128, %s257_s2, [#allocation4]  }
  0x53   :  { %197 = dma.done.wait [#allocation4], 128  }
  0x54   :  { %198 = vsyncadd [#allocation4], 4294967168 }
  0x55   :  { %104 = vsyncpa [#allocation3], 1 }
  0x56   :  { %105 = vsyncpa [#allocation6], 1 }
  0x57   :  { %106 = vsyncpa [#allocation4], 1 }

</bundles_post_ra>
